<compile_context>
chip_gen: v7x
topology: tpu7x:2x2x1
jax: 0.10.0
libtpu: 0.0.40
codegen_flags: <defaults>
</compile_context>

<pallas_src>
import jax
import jax.numpy as jnp
import numpy as np
from jax.experimental import pallas as pl
from jax.experimental.pallas import tpu as pltpu

# ---- Problem sizes (LunarLander-v2 + C51 constants from the module) --------
NUM_INPUTS = 8           # LunarLander-v2 observation dim
NUM_ACTIONS = 4
NUM_ATOMS = 51
VMIN, VMAX = -10, 10

# ---- TPU-friendly padded sizes ---------------------------------------------
IN_PAD = 128             # pad num_inputs to a lane multiple
H1, H2, H3 = 128, 128, 512
ATOM_PAD = 64            # per-action atom group (two actions per 128-lane vreg)
OUT_PAD = NUM_ACTIONS * ATOM_PAD   # 256
W_DTYPE = jnp.bfloat16   # weight storage / MXU input dtype
NEG_BIG = -1.0e30        # bias sentinel for padded atom lanes
EXP_FLOOR = -60.0        # floor on exp argument: exp(-60) ~ 9e-27, no denormals
M_TILE_MAX = 256         # row tile for large batches (v6e/v7x MXU is 2x256^2)
B_EXAMPLE = 2            # example batch


def _round_up(n, m):
    return ((n + m - 1) // m) * m


def _c51_kernel(x_ref, w12_ref, w3_ref, w4_ref, bias_ref, out_ref):
    """One row-tile of the C51 forward pass."""
    bias = bias_ref[...]                              # (4, 512) f32

    def dense(h, w, b):
        return jnp.dot(h.astype(W_DTYPE), w,
                       preferred_element_type=jnp.float32) + b

    h = jnp.maximum(dense(x_ref[...], w12_ref[0], bias[0:1, :H1]), 0.0)
    h = jnp.maximum(dense(h, w12_ref[1], bias[1:2, :H2]), 0.0)
    h = jnp.maximum(dense(h, w3_ref[...], bias[2:3, :H3]), 0.0)
    logits = dense(h, w4_ref[...], bias[3:4, :OUT_PAD])   # (M, 256) f32

    # Per-(row, action) softmax over 51 real atoms living in 64-lane groups.
    # Padded lanes (atom 51..63) carry the NEG_BIG bias sentinel -> never the
    # max; the EXP_FLOOR clamp keeps their exp at ~9e-27 (negligible, no mask).
    blocks = []
    for a in range(NUM_ACTIONS):
        sl = logits[:, a * ATOM_PAD:(a + 1) * ATOM_PAD]          # (M, 64)
        m = jnp.max(sl, axis=-1, keepdims=True)                  # per-action max
        e = jnp.exp(jnp.maximum(sl - m, EXP_FLOOR))
        d = jnp.sum(e, axis=-1, keepdims=True)
        inv = pl.reciprocal(d, approx=True)
        inv = inv * (2.0 - d * inv)          # one Newton step -> ~f32 accuracy
        blocks.append(e * inv)
    out_ref[...] = jnp.concatenate(blocks, axis=-1)   # one lane-dense slab store


# ---- One-time parameter preparation (cache the result!) ---------------------
def prepare_params(params):
    """Pad / pack / bf16-convert the weights once; reuse on every call."""
    w1, b1, w2, b2, w3, b3, w4, b4 = params

    # Stack layer-1/2 weights into a single operand (one prologue DMA).
    w1_pad = jnp.zeros((IN_PAD, H1), jnp.float32).at[:NUM_INPUTS, :].set(w1)
    w12 = jnp.stack([w1_pad, w2], axis=0).astype(W_DTYPE)        # (2,128,128)

    # Final layer: each action's 51 atoms live in a 64-lane group; padded
    # lanes get a NEG_BIG bias sentinel so they vanish in the softmax.
    w4_pad = jnp.zeros((H3, OUT_PAD), jnp.float32)
    b4_pad = jnp.full((OUT_PAD,), NEG_BIG, jnp.float32)
    for a in range(NUM_ACTIONS):
        c = a * ATOM_PAD
        w4_pad = w4_pad.at[:, c:c + NUM_ATOMS].set(
            w4[:, a * NUM_ATOMS:(a + 1) * NUM_ATOMS])
        b4_pad = b4_pad.at[c:c + NUM_ATOMS].set(
            b4[a * NUM_ATOMS:(a + 1) * NUM_ATOMS])

    # Pack all biases into one (4, 512) f32 buffer (one prologue DMA).
    biases = jnp.zeros((4, H3), jnp.float32)
    biases = biases.at[0, :H1].set(b1)
    biases = biases.at[1, :H2].set(b2)
    biases = biases.at[2, :H3].set(b3)
    biases = biases.at[3, :OUT_PAD].set(b4_pad)

    return dict(
        w12=w12,
        w3=w3.astype(W_DTYPE),          # (128, 512)
        w4=w4_pad.astype(W_DTYPE),      # (512, 256)
        biases=biases,                  # (4, 512) f32
    )


@jax.jit
def categorical_dqn_forward(x, prepared):
    """x: [B, NUM_INPUTS] f32 -> probs [B, NUM_ACTIONS, NUM_ATOMS] f32."""
    assert x.ndim == 2 and x.shape[1] == NUM_INPUTS, x.shape
    b = x.shape[0]

    # Row tiling: small batches -> one tile covering the whole (padded) batch;
    # large batches -> 256-row tiles over a "parallel" grid (2 TCs on v7x).
    if b <= M_TILE_MAX:
        b_pad = max(8, _round_up(b, 8))
        m_tile = b_pad
    else:
        m_tile = M_TILE_MAX
        b_pad = _round_up(b, m_tile)
    grid_m = b_pad // m_tile

    x_pad = jnp.zeros((b_pad, IN_PAD), jnp.float32)
    x_pad = x_pad.at[:b, :NUM_INPUTS].set(x.astype(jnp.float32))

    grid_spec = pltpu.PrefetchScalarGridSpec(
        num_scalar_prefetch=0,
        grid=(grid_m,),
        in_specs=[
            pl.BlockSpec((m_tile, IN_PAD), lambda i: (i, 0)),     # x tile
            pl.BlockSpec((2, H1, H1), lambda i: (0, 0, 0)),       # w1+w2 (bf16)
            pl.BlockSpec((H2, H3), lambda i: (0, 0)),             # w3 (bf16)
            pl.BlockSpec((H3, OUT_PAD), lambda i: (0, 0)),        # w4 (bf16)
            pl.BlockSpec((4, H3), lambda i: (0, 0)),              # packed biases
        ],
        out_specs=pl.BlockSpec((m_tile, OUT_PAD), lambda i: (i, 0)),
    )

    out_pad = pl.pallas_call(
        _c51_kernel,
        out_shape=jax.ShapeDtypeStruct((b_pad, OUT_PAD), jnp.float32),
        grid_spec=grid_spec,
        compiler_params=pltpu.CompilerParams(
            dimension_semantics=("parallel",)),
    )(x_pad, prepared["w12"], prepared["w3"], prepared["w4"],
      prepared["biases"])

    probs = out_pad[:b].reshape(b, NUM_ACTIONS, ATOM_PAD)[:, :, :NUM_ATOMS]
    return probs


# ---- Deterministic parameter construction (mirrors the torch __init__) -----
def _scale_noise(key, size):
    x = jax.random.normal(key, (size,), dtype=jnp.float32)
    return jnp.sign(x) * jnp.sqrt(jnp.abs(x))


def init_params(key):
    ks = jax.random.split(key, 14)

    def linear(kw, kb, fan_in, fan_out):
        bound = 1.0 / np.sqrt(fan_in)
        w = jax.random.uniform(kw, (fan_in, fan_out), jnp.float32, -bound, bound)
        b = jax.random.uniform(kb, (fan_out,), jnp.float32, -bound, bound)
        return w, b

    def noisy(kw, kb, kei, keo, kbe, fan_in, fan_out, std_init=0.4):
        mu_range = 1.0 / np.sqrt(fan_in)
        w_mu = jax.random.uniform(kw, (fan_in, fan_out), jnp.float32,
                                  -mu_range, mu_range)
        w_sigma = jnp.full((fan_in, fan_out), std_init / np.sqrt(fan_in),
                           jnp.float32)
        b_mu = jax.random.uniform(kb, (fan_out,), jnp.float32,
                                  -mu_range, mu_range)
        b_sigma = jnp.full((fan_out,), std_init / np.sqrt(fan_out), jnp.float32)
        eps_in = _scale_noise(kei, fan_in)
        eps_out = _scale_noise(keo, fan_out)
        w_eps = jnp.outer(eps_in, eps_out)          # transposed vs torch [out,in]
        b_eps = _scale_noise(kbe, fan_out)
        # training-mode effective parameters: mu + sigma * epsilon
        return w_mu + w_sigma * w_eps, b_mu + b_sigma * b_eps

    w1, b1 = linear(ks[0], ks[1], NUM_INPUTS, H1)
    w2, b2 = linear(ks[2], ks[3], H1, H2)
    w3, b3 = noisy(ks[4], ks[5], ks[6], ks[7], ks[8], H2, H3)
    w4, b4 = noisy(ks[9], ks[10], ks[11], ks[12], ks[13],
                   H3, NUM_ACTIONS * NUM_ATOMS)
    return (w1, b1, w2, b2, w3, b3, w4, b4)


# ---- Pure-JAX references for correctness ------------------------------------
def reference_forward(x, params, weight_dtype=jnp.float32, precision=None):
    """weight_dtype=bf16 reproduces the kernel's quantization; weight_dtype=f32
    + HIGHEST precision reproduces the original torch module."""
    w1, b1, w2, b2, w3, b3, w4, b4 = params

    def dense(h, w, b):
        return jnp.dot(h.astype(weight_dtype), w.astype(weight_dtype),
                       preferred_element_type=jnp.float32,
                       precision=precision) + b

    h = jax.nn.relu(dense(x, w1, b1))
    h = jax.nn.relu(dense(h, w2, b2))
    h = jax.nn.relu(dense(h, w3, b3))
    logits = dense(h, w4, b4)
    probs = jax.nn.softmax(logits.reshape(-1, NUM_ATOMS), axis=-1)
    return probs.reshape(-1, NUM_ACTIONS, NUM_ATOMS)


if __name__ == "__main__":
    key = jax.random.PRNGKey(0)
    k_params, k_x, k_xb = jax.random.split(key, 3)
    params = init_params(k_params)
    prepared = prepare_params(params)           # one-time cached packed weights

    # --- small act()-style batch ---------------------------------------------
    x = jax.random.normal(k_x, (B_EXAMPLE, NUM_INPUTS), dtype=jnp.float32)
    out = jax.block_until_ready(categorical_dqn_forward(x, prepared))
    assert out.shape == (B_EXAMPLE, NUM_ACTIONS, NUM_ATOMS), out.shape

    # Tight check: reference using the same bf16 weight/activation quantization.
    ref_bf16 = reference_forward(x, params, weight_dtype=jnp.bfloat16)
    np.testing.assert_allclose(np.asarray(out), np.asarray(ref_bf16),
                               rtol=2e-3, atol=1e-6)

    # Semantics check: full-f32 forward (the torch module), bf16-relaxed tol.
    ref_f32 = reference_forward(x, params, weight_dtype=jnp.float32,
                                precision=jax.lax.Precision.HIGHEST)
    np.testing.assert_allclose(np.asarray(out), np.asarray(ref_f32),
                               rtol=1e-2, atol=1e-3)

    # each (batch, action) atom distribution sums to 1
    np.testing.assert_allclose(np.asarray(out).sum(-1),
                               np.ones((B_EXAMPLE, NUM_ACTIONS)),
                               rtol=1e-5, atol=1e-5)

    # --- batched training-style call: exercises the row-tiled parallel grid ---
    BB = 300
    xb = jax.random.normal(k_xb, (BB, NUM_INPUTS), dtype=jnp.float32)
    outb = jax.block_until_ready(categorical_dqn_forward(xb, prepared))
    assert outb.shape == (BB, NUM_ACTIONS, NUM_ATOMS), outb.shape
    refb = reference_forward(xb, params, weight_dtype=jnp.bfloat16)
    np.testing.assert_allclose(np.asarray(outb), np.asarray(refb),
                               rtol=2e-3, atol=1e-6)
    np.testing.assert_allclose(np.asarray(outb).sum(-1),
                               np.ones((BB, NUM_ACTIONS)),
                               rtol=1e-5, atol=1e-5)

    print("KERNEL_OK")
</pallas_src>

<mosaic_0001>
module attributes {stable_mosaic.version = 11 : i64} {
  func.func @_c51_kernel(%arg0: i32, %arg1: memref<8x128xf32, #tpu.memory_space<vmem>>, %arg2: memref<2x128x128xbf16, #tpu.memory_space<vmem>>, %arg3: memref<128x512xbf16, #tpu.memory_space<vmem>>, %arg4: memref<512x256xbf16, #tpu.memory_space<vmem>>, %arg5: memref<4x512xf32, #tpu.memory_space<vmem>>, %arg6: memref<8x256xf32, #tpu.memory_space<vmem>>) attributes {dimension_semantics = [#tpu.dimension_semantics<parallel>], iteration_bounds = array<i64: 1>, scalar_prefetch = 0 : i64, scratch_operands = 0 : i64, tpu.core_type = #tpu.core_type<tc>, window_params = [{transform_indices = @transform_0, window_bounds = array<i64: 8, 128>}, {pipeline_mode = #tpu.pipeline_mode<synchronous>, transform_indices = @transform_1, window_bounds = array<i64: 2, 128, 128>}, {pipeline_mode = #tpu.pipeline_mode<synchronous>, transform_indices = @transform_2, window_bounds = array<i64: 128, 512>}, {pipeline_mode = #tpu.pipeline_mode<synchronous>, transform_indices = @transform_3, window_bounds = array<i64: 512, 256>}, {pipeline_mode = #tpu.pipeline_mode<synchronous>, transform_indices = @transform_4, window_bounds = array<i64: 4, 512>}, {transform_indices = @transform_5, window_bounds = array<i64: 8, 256>}]} {
    %c0 = arith.constant 0 : index
    %c0_0 = arith.constant 0 : index
    %0 = vector.load %arg5[%c0, %c0_0] : memref<4x512xf32, #tpu.memory_space<vmem>>, vector<4x512xf32>
    %c0_1 = arith.constant 0 : index
    %c0_2 = arith.constant 0 : index
    %1 = vector.load %arg1[%c0_1, %c0_2] : memref<8x128xf32, #tpu.memory_space<vmem>>, vector<8x128xf32>
    %c0_3 = arith.constant 0 : index
    %c0_4 = arith.constant 0 : index
    %c0_5 = arith.constant 0 : index
    %2 = vector.load %arg2[%c0_3, %c0_4, %c0_5] : memref<2x128x128xbf16, #tpu.memory_space<vmem>>, vector<1x128x128xbf16>
    %3 = vector.shape_cast %2 : vector<1x128x128xbf16> to vector<128x128xbf16>
    %4 = vector.extract_strided_slice %0 {offsets = [0, 0], sizes = [1, 128], strides = [1, 1]} : vector<4x512xf32> to vector<1x128xf32>
    %5 = arith.truncf %1 : vector<8x128xf32> to vector<8x128xbf16>
    %cst = arith.constant dense<0.000000e+00> : vector<8x128xf32>
    %6 = tpu.matmul %5, %3, %cst {dimension_numbers = #tpu.dot_dimension_numbers<[1], [0], [0], [1], [0, 0, 1, 1], [], []>} : vector<8x128xbf16>, vector<128x128xbf16>, vector<8x128xf32> -> vector<8x128xf32>
    %7 = vector.broadcast %4 : vector<1x128xf32> to vector<8x128xf32>
    %8 = arith.addf %6, %7 : vector<8x128xf32>
    %cst_6 = arith.constant 0.000000e+00 : f32
    %9 = vector.broadcast %cst_6 : f32 to vector<8x128xf32>
    %10 = arith.maximumf %8, %9 : vector<8x128xf32>
    %c1 = arith.constant 1 : index
    %c0_7 = arith.constant 0 : index
    %c0_8 = arith.constant 0 : index
    %11 = vector.load %arg2[%c1, %c0_7, %c0_8] : memref<2x128x128xbf16, #tpu.memory_space<vmem>>, vector<1x128x128xbf16>
    %12 = vector.shape_cast %11 : vector<1x128x128xbf16> to vector<128x128xbf16>
    %13 = vector.extract_strided_slice %0 {offsets = [1, 0], sizes = [1, 128], strides = [1, 1]} : vector<4x512xf32> to vector<1x128xf32>
    %14 = arith.truncf %10 : vector<8x128xf32> to vector<8x128xbf16>
    %cst_9 = arith.constant dense<0.000000e+00> : vector<8x128xf32>
    %15 = tpu.matmul %14, %12, %cst_9 {dimension_numbers = #tpu.dot_dimension_numbers<[1], [0], [0], [1], [0, 0, 1, 1], [], []>} : vector<8x128xbf16>, vector<128x128xbf16>, vector<8x128xf32> -> vector<8x128xf32>
    %16 = vector.broadcast %13 : vector<1x128xf32> to vector<8x128xf32>
    %17 = arith.addf %15, %16 : vector<8x128xf32>
    %cst_10 = arith.constant 0.000000e+00 : f32
    %18 = vector.broadcast %cst_10 : f32 to vector<8x128xf32>
    %19 = arith.maximumf %17, %18 : vector<8x128xf32>
    %c0_11 = arith.constant 0 : index
    %c0_12 = arith.constant 0 : index
    %20 = vector.load %arg3[%c0_11, %c0_12] : memref<128x512xbf16, #tpu.memory_space<vmem>>, vector<128x512xbf16>
    %21 = vector.extract_strided_slice %0 {offsets = [2, 0], sizes = [1, 512], strides = [1, 1]} : vector<4x512xf32> to vector<1x512xf32>
    %22 = arith.truncf %19 : vector<8x128xf32> to vector<8x128xbf16>
    %cst_13 = arith.constant dense<0.000000e+00> : vector<8x512xf32>
    %23 = tpu.matmul %22, %20, %cst_13 {dimension_numbers = #tpu.dot_dimension_numbers<[1], [0], [0], [1], [0, 0, 1, 1], [], []>} : vector<8x128xbf16>, vector<128x512xbf16>, vector<8x512xf32> -> vector<8x512xf32>
    %24 = vector.broadcast %21 : vector<1x512xf32> to vector<8x512xf32>
    %25 = arith.addf %23, %24 : vector<8x512xf32>
    %cst_14 = arith.constant 0.000000e+00 : f32
    %26 = vector.broadcast %cst_14 : f32 to vector<8x512xf32>
    %27 = arith.maximumf %25, %26 : vector<8x512xf32>
    %c0_15 = arith.constant 0 : index
    %c0_16 = arith.constant 0 : index
    %28 = vector.load %arg4[%c0_15, %c0_16] : memref<512x256xbf16, #tpu.memory_space<vmem>>, vector<512x256xbf16>
    %29 = vector.extract_strided_slice %0 {offsets = [3, 0], sizes = [1, 256], strides = [1, 1]} : vector<4x512xf32> to vector<1x256xf32>
    %30 = arith.truncf %27 : vector<8x512xf32> to vector<8x512xbf16>
    %cst_17 = arith.constant dense<0.000000e+00> : vector<8x256xf32>
    %31 = tpu.matmul %30, %28, %cst_17 {dimension_numbers = #tpu.dot_dimension_numbers<[1], [0], [0], [1], [0, 0, 1, 1], [], []>} : vector<8x512xbf16>, vector<512x256xbf16>, vector<8x256xf32> -> vector<8x256xf32>
    %32 = vector.broadcast %29 : vector<1x256xf32> to vector<8x256xf32>
    %33 = arith.addf %31, %32 : vector<8x256xf32>
    %34 = vector.extract_strided_slice %33 {offsets = [0, 0], sizes = [8, 64], strides = [1, 1]} : vector<8x256xf32> to vector<8x64xf32>
    %cst_18 = arith.constant dense<0xFF800000> : vector<8xf32>
    %35 = vector.multi_reduction <maximumf>, %34, %cst_18 [1] : vector<8x64xf32> to vector<8xf32>
    %36 = vector.shape_cast %35 : vector<8xf32> to vector<8x1xf32>
    %37 = vector.broadcast %36 : vector<8x1xf32> to vector<8x64xf32>
    %38 = arith.subf %34, %37 : vector<8x64xf32>
    %cst_19 = arith.constant -6.000000e+01 : f32
    %39 = vector.broadcast %cst_19 : f32 to vector<8x64xf32>
    %40 = arith.maximumf %38, %39 : vector<8x64xf32>
    %41 = math.exp %40 : vector<8x64xf32>
    %cst_20 = arith.constant dense<0.000000e+00> : vector<8xf32>
    %42 = vector.multi_reduction <add>, %41, %cst_20 [1] : vector<8x64xf32> to vector<8xf32>
    %43 = vector.shape_cast %42 : vector<8xf32> to vector<8x1xf32>
    %44 = tpu.reciprocal %43 {approx = true} : vector<8x1xf32> -> vector<8x1xf32>
    %45 = arith.mulf %43, %44 : vector<8x1xf32>
    %cst_21 = arith.constant 2.000000e+00 : f32
    %46 = vector.broadcast %cst_21 : f32 to vector<8x1xf32>
    %47 = arith.subf %46, %45 : vector<8x1xf32>
    %48 = arith.mulf %44, %47 : vector<8x1xf32>
    %49 = vector.broadcast %48 : vector<8x1xf32> to vector<8x64xf32>
    %50 = arith.mulf %41, %49 : vector<8x64xf32>
    %51 = vector.extract_strided_slice %33 {offsets = [0, 64], sizes = [8, 64], strides = [1, 1]} : vector<8x256xf32> to vector<8x64xf32>
    %cst_22 = arith.constant dense<0xFF800000> : vector<8xf32>
    %52 = vector.multi_reduction <maximumf>, %51, %cst_22 [1] : vector<8x64xf32> to vector<8xf32>
    %53 = vector.shape_cast %52 : vector<8xf32> to vector<8x1xf32>
    %54 = vector.broadcast %53 : vector<8x1xf32> to vector<8x64xf32>
    %55 = arith.subf %51, %54 : vector<8x64xf32>
    %cst_23 = arith.constant -6.000000e+01 : f32
    %56 = vector.broadcast %cst_23 : f32 to vector<8x64xf32>
    %57 = arith.maximumf %55, %56 : vector<8x64xf32>
    %58 = math.exp %57 : vector<8x64xf32>
    %cst_24 = arith.constant dense<0.000000e+00> : vector<8xf32>
    %59 = vector.multi_reduction <add>, %58, %cst_24 [1] : vector<8x64xf32> to vector<8xf32>
    %60 = vector.shape_cast %59 : vector<8xf32> to vector<8x1xf32>
    %61 = tpu.reciprocal %60 {approx = true} : vector<8x1xf32> -> vector<8x1xf32>
    %62 = arith.mulf %60, %61 : vector<8x1xf32>
    %cst_25 = arith.constant 2.000000e+00 : f32
    %63 = vector.broadcast %cst_25 : f32 to vector<8x1xf32>
    %64 = arith.subf %63, %62 : vector<8x1xf32>
    %65 = arith.mulf %61, %64 : vector<8x1xf32>
    %66 = vector.broadcast %65 : vector<8x1xf32> to vector<8x64xf32>
    %67 = arith.mulf %58, %66 : vector<8x64xf32>
    %68 = vector.extract_strided_slice %33 {offsets = [0, 128], sizes = [8, 64], strides = [1, 1]} : vector<8x256xf32> to vector<8x64xf32>
    %cst_26 = arith.constant dense<0xFF800000> : vector<8xf32>
    %69 = vector.multi_reduction <maximumf>, %68, %cst_26 [1] : vector<8x64xf32> to vector<8xf32>
    %70 = vector.shape_cast %69 : vector<8xf32> to vector<8x1xf32>
    %71 = vector.broadcast %70 : vector<8x1xf32> to vector<8x64xf32>
    %72 = arith.subf %68, %71 : vector<8x64xf32>
    %cst_27 = arith.constant -6.000000e+01 : f32
    %73 = vector.broadcast %cst_27 : f32 to vector<8x64xf32>
    %74 = arith.maximumf %72, %73 : vector<8x64xf32>
    %75 = math.exp %74 : vector<8x64xf32>
    %cst_28 = arith.constant dense<0.000000e+00> : vector<8xf32>
    %76 = vector.multi_reduction <add>, %75, %cst_28 [1] : vector<8x64xf32> to vector<8xf32>
    %77 = vector.shape_cast %76 : vector<8xf32> to vector<8x1xf32>
    %78 = tpu.reciprocal %77 {approx = true} : vector<8x1xf32> -> vector<8x1xf32>
    %79 = arith.mulf %77, %78 : vector<8x1xf32>
    %cst_29 = arith.constant 2.000000e+00 : f32
    %80 = vector.broadcast %cst_29 : f32 to vector<8x1xf32>
    %81 = arith.subf %80, %79 : vector<8x1xf32>
    %82 = arith.mulf %78, %81 : vector<8x1xf32>
    %83 = vector.broadcast %82 : vector<8x1xf32> to vector<8x64xf32>
    %84 = arith.mulf %75, %83 : vector<8x64xf32>
    %85 = vector.extract_strided_slice %33 {offsets = [0, 192], sizes = [8, 64], strides = [1, 1]} : vector<8x256xf32> to vector<8x64xf32>
    %cst_30 = arith.constant dense<0xFF800000> : vector<8xf32>
    %86 = vector.multi_reduction <maximumf>, %85, %cst_30 [1] : vector<8x64xf32> to vector<8xf32>
    %87 = vector.shape_cast %86 : vector<8xf32> to vector<8x1xf32>
    %88 = vector.broadcast %87 : vector<8x1xf32> to vector<8x64xf32>
    %89 = arith.subf %85, %88 : vector<8x64xf32>
    %cst_31 = arith.constant -6.000000e+01 : f32
    %90 = vector.broadcast %cst_31 : f32 to vector<8x64xf32>
    %91 = arith.maximumf %89, %90 : vector<8x64xf32>
    %92 = math.exp %91 : vector<8x64xf32>
    %cst_32 = arith.constant dense<0.000000e+00> : vector<8xf32>
    %93 = vector.multi_reduction <add>, %92, %cst_32 [1] : vector<8x64xf32> to vector<8xf32>
    %94 = vector.shape_cast %93 : vector<8xf32> to vector<8x1xf32>
    %95 = tpu.reciprocal %94 {approx = true} : vector<8x1xf32> -> vector<8x1xf32>
    %96 = arith.mulf %94, %95 : vector<8x1xf32>
    %cst_33 = arith.constant 2.000000e+00 : f32
    %97 = vector.broadcast %cst_33 : f32 to vector<8x1xf32>
    %98 = arith.subf %97, %96 : vector<8x1xf32>
    %99 = arith.mulf %95, %98 : vector<8x1xf32>
    %100 = vector.broadcast %99 : vector<8x1xf32> to vector<8x64xf32>
    %101 = arith.mulf %92, %100 : vector<8x64xf32>
    %102 = tpu.concatenate %50, %67, %84, %101 in 1 : vector<8x64xf32>, vector<8x64xf32>, vector<8x64xf32>, vector<8x64xf32> -> vector<8x256xf32>
    %c0_34 = arith.constant 0 : index
    %c0_35 = arith.constant 0 : index
    %103 = vector.load %arg6[%c0_34, %c0_35] : memref<8x256xf32, #tpu.memory_space<vmem>>, vector<8x256xf32>
    tpu.vector_store %arg6[%c0_34, %c0_35], %102 {strides = array<i32>} : memref<8x256xf32, #tpu.memory_space<vmem>>, vector<8x256xf32>,
    return
  }
  func.func @transform_0(%arg0: i32) -> (i32, i32) {
    %c0_i32 = arith.constant 0 : i32
    %c0_i32_0 = arith.constant 0 : i32
    return %arg0, %c0_i32 : i32, i32
  }
  func.func @transform_1(%arg0: i32) -> (i32, i32, i32) {
    %c0_i32 = arith.constant 0 : i32
    %c0_i32_0 = arith.constant 0 : i32
    %c0_i32_1 = arith.constant 0 : i32
    %c0_i32_2 = arith.constant 0 : i32
    return %c0_i32, %c0_i32_0, %c0_i32_1 : i32, i32, i32
  }
  func.func @transform_2(%arg0: i32) -> (i32, i32) {
    %c0_i32 = arith.constant 0 : i32
    %c0_i32_0 = arith.constant 0 : i32
    %c0_i32_1 = arith.constant 0 : i32
    return %c0_i32, %c0_i32_0 : i32, i32
  }
  func.func @transform_3(%arg0: i32) -> (i32, i32) {
    %c0_i32 = arith.constant 0 : i32
    %c0_i32_0 = arith.constant 0 : i32
    %c0_i32_1 = arith.constant 0 : i32
    return %c0_i32, %c0_i32_0 : i32, i32
  }
  func.func @transform_4(%arg0: i32) -> (i32, i32) {
    %c0_i32 = arith.constant 0 : i32
    %c0_i32_0 = arith.constant 0 : i32
    %c0_i32_1 = arith.constant 0 : i32
    return %c0_i32, %c0_i32_0 : i32, i32
  }
  func.func @transform_5(%arg0: i32) -> (i32, i32) {
    %c0_i32 = arith.constant 0 : i32
    %c0_i32_0 = arith.constant 0 : i32
    return %arg0, %c0_i32 : i32, i32
  }
}

</mosaic_0001>

<bundles_post_ra>
// kernel: categorical_dqn_forward.1
= control target key start
LH: loop header
LB: loop body
LE: loop exit
PB: predicated region body
PF: predicated region fallthrough
CT: control target
= control target key end

     0   :  { %10 = vsyncpa [#allocation3], 0  ;;  %s1769_s0 = inlined_call_operand.vmem [shape: f32[8,128], index: 0, kind: input, shape index: {}]   ;;  %s1770_s1 = inlined_call_operand.hbm [shape: bf16[2,128,128], index: 1, kind: input, shape index: {}]   ;;  %s1771_s2 = inlined_call_operand.hbm [shape: bf16[128,512], index: 2, kind: input, shape index: {}]   ;;  %s1772_s3 = inlined_call_operand.hbm [shape: bf16[512,256], index: 3, kind: input, shape index: {}]   ;;  %s1773_s4 = inlined_call_operand.hbm [shape: f32[4,512], index: 4, kind: input, shape index: {}]   ;;  %s1774_s5 = inlined_call_operand.vmem [shape: f32[8,256], index: 5, kind: output, shape index: {}]  }
   0x1   :  { %11 = vsyncpa [#allocation5], 0 }
   0x2   :  { %12 = vsyncpa [#allocation8], 0  ;;  %s1641_s18 = smov [#allocation4]   ;;  %s1547_s22 = scalar_lea.hbm %s1771_s2, 4096 }
   0x3   :  { %s32_s19 = sshll.u32 %s1641_s18, 4  ;;  %p1548_p0 = scmp.ne.s32.totalorder %s1771_s2, %s1547_s22  ;;  %s33_s19 = int_to_ptr.vmem [resolvable:$true] %s32_s19 }
   0x4   :  { %p1551_p1 = scmp.lt.u32.totalorder %s1547_s22, %s1771_s2 }
   0x6   :  { %p1553_p2 = pnand %p1551_p1, %p1548_p0 }
   0x8   :  { %1556 = shalt.err (!%p1553_p2)
}
   0x9   :  { %s1557_s27 = scalar_lea.vmem %s33_s19, 4096  ;;  %p1562_p4 = scmp.lt.s32.totalorder %s33_s19, %s33_s19 }
   0xa   :  { %p1558_p3 = scmp.ne.s32.totalorder %s33_s19, %s1557_s27  ;;  %p1563_p5 = scmp.lt.s32.totalorder %s1557_s27, %s1557_s27 }
   0xc   :  { %p1564_p6 = por %p1563_p5, %p1562_p4 }
   0xe   :  { %p1565_p7 = pnand %p1564_p6, %p1558_p3 }
  0x10   :  { %1568 = shalt.err (!%p1565_p7)
}
  0x11   :  { %s1642_s28 = smov 256   ;;  %s1643_s29 = smov 16  }
  0x12   :  { %38 = dma.hbm_to_vmem [thread:$0]  %s1771_s2, 4096, %s33_s19, [#allocation5], %s1642_s28, %s1642_s28, %s1643_s29  }
  0x13   :  { %s1644_s7 = smov [#allocation2]   ;;  %s1569_s11 = scalar_lea.hbm %s1770_s1, 2048 }
  0x14   :  { %s20_s8 = sshll.u32 %s1644_s7, 4  ;;  %p1570_p8 = scmp.ne.s32.totalorder %s1770_s1, %s1569_s11  ;;  %s21_s8 = int_to_ptr.vmem [resolvable:$true] %s20_s8 }
  0x15   :  { %p1573_p9 = scmp.lt.u32.totalorder %s1569_s11, %s1770_s1 }
  0x17   :  { %p1575_p10 = pnand %p1573_p9, %p1570_p8 }
  0x19   :  { %1578 = shalt.err (!%p1575_p10)
}
  0x1a   :  { %s1579_s16 = scalar_lea.vmem %s21_s8, 2048  ;;  %p1584_p12 = scmp.lt.s32.totalorder %s21_s8, %s21_s8 }
  0x1b   :  { %p1580_p11 = scmp.ne.s32.totalorder %s21_s8, %s1579_s16  ;;  %p1585_p13 = scmp.lt.s32.totalorder %s1579_s16, %s1579_s16 }
  0x1d   :  { %p1586_p0 = por %p1585_p13, %p1584_p12 }
  0x1f   :  { %p1587_p1 = pnand %p1586_p0, %p1580_p11 }
  0x21   :  { %1590 = shalt.err (!%p1587_p1)
}
  0x22   :  { %s1645_s2 = smov 64   ;;  %s1646_s17 = smov 4  }
  0x23   :  { %26 = dma.hbm_to_vmem [thread:$0]  %s1770_s1, 2048, %s21_s8, [#allocation3], %s1645_s2, %s1645_s2, %s1646_s17  }
  0x24   :  { %s1647_s20 = smov [#allocation6]   ;;  %s1591_s24 = scalar_lea.hbm %s1772_s3, 8192 }
  0x25   :  { %s44_s21 = sshll.u32 %s1647_s20, 4  ;;  %p1592_p2 = scmp.ne.s32.totalorder %s1772_s3, %s1591_s24  ;;  %s45_s21 = int_to_ptr.vmem [resolvable:$true] %s44_s21 }
  0x26   :  { %p1595_p3 = scmp.lt.u32.totalorder %s1591_s24, %s1772_s3 }
  0x28   :  { %p1597_p4 = pnand %p1595_p3, %p1592_p2 }
  0x2a   :  { %1600 = shalt.err (!%p1597_p4)
}
  0x2b   :  { %s1601_s29 = scalar_lea.vmem %s45_s21, 8192  ;;  %p1606_p6 = scmp.lt.s32.totalorder %s45_s21, %s45_s21 }
  0x2c   :  { %p1602_p5 = scmp.ne.s32.totalorder %s45_s21, %s1601_s29  ;;  %p1607_p7 = scmp.lt.s32.totalorder %s1601_s29, %s1601_s29 }
  0x2e   :  { %p1608_p8 = por %p1607_p7, %p1606_p6 }
  0x30   :  { %p1609_p9 = pnand %p1608_p8, %p1602_p5 }
  0x32   :  { %1612 = shalt.err (!%p1609_p9)
}
  0x33   :  { %s1648_s1 = smov 128   ;;  %s1649_s30 = smov 8  }
  0x34   :  { %50 = dma.hbm_to_vmem [thread:$0]  %s1772_s3, 8192, %s45_s21, [#allocation5], %s1648_s1, %s1648_s1, %s1649_s30  }
  0x35   :  { %s1650_s8 = smov [#allocation7]   ;;  %s1613_s12 = scalar_lea.hbm %s1773_s4, 256 }
  0x36   :  { %s57_s9 = sshll.u32 %s1650_s8, 4  ;;  %p1614_p10 = scmp.ne.s32.totalorder %s1773_s4, %s1613_s12  ;;  %s58_s9 = int_to_ptr.vmem [resolvable:$true] %s57_s9 }
  0x37   :  { %p1617_p11 = scmp.lt.u32.totalorder %s1613_s12, %s1773_s4 }
  0x39   :  { %p1619_p12 = pnand %p1617_p11, %p1614_p10 }
  0x3b   :  { %1622 = shalt.err (!%p1619_p12)
}
  0x3c   :  { %s1623_s17 = scalar_lea.vmem %s58_s9, 256  ;;  %p1628_p0 = scmp.lt.s32.totalorder %s58_s9, %s58_s9 }
  0x3d   :  { %p1624_p13 = scmp.ne.s32.totalorder %s58_s9, %s1623_s17  ;;  %p1629_p1 = scmp.lt.s32.totalorder %s1623_s17, %s1623_s17 }
  0x3f   :  { %p1630_p2 = por %p1629_p1, %p1628_p0 }
  0x41   :  { %p1631_p3 = pnand %p1630_p2, %p1624_p13 }
  0x43   :  { %1634 = shalt.err (!%p1631_p3)
}
  0x44   :  { %60 = dma.hbm_to_vmem [thread:$0]  %s1773_s4, 256, %s58_s9, [#allocation8]  }
  0x45   :  { %1635 = dma.done.wait [#allocation3], 2048  }
  0x46   :  { %1636 = vsyncadd [#allocation3], 4294965248 }
  0x47   :  { %1637 = dma.done.wait [#allocation5], 12288  }
  0x48   :  { %1638 = vsyncadd [#allocation5], 4294955008 }
  0x49   :  { %1639 = dma.done.wait [#allocation8], 256  }
  0x4a   :  { %1640 = vsyncadd [#allocation8], 4294967040  ;;  %v1651_v0 = vmov 0.0   ;;  %vm1652_vm0 = vmmov 0   ;;  %v1371_v1 = vld [vmem:[#allocation2] sm:$0xff]   ;;  %v1372_v2 = vld [vmem:[#allocation2 + $0x8] sm:$0xff]   ;;  %v94_v34 = vlaneseq }
  0x4b   :  { %1314 = vmatprep.subr.bf16.mxu0 %v1651_v0  ;;  %1330 = vmatprep.mubr.msk.bf16.mxu0 %vm1652_vm0, %v1651_v0  ;;  %v1373_v3 = vld [vmem:[#allocation2 + $0x10] sm:$0xff]   ;;  %v1379_v4 = vld [vmem:[#allocation2 + $0x40] sm:$0xff]   ;;  %v1374_v5 = vld [vmem:[#allocation2 + $0x18] sm:$0xff]   ;;  %v1653_v63 = vmov 0   ;;  %vm1119_vm1 = vcmask 1048064   ;;  %vm1103_vm2 = vcmask 523264  }
  0x4c   :  { %1334 = vmatprep.subr.bf16.mxu1 %v1651_v0  ;;  %1350 = vmatprep.mubr.msk.bf16.mxu1 %vm1652_vm0, %v1651_v0  ;;  %v1380_v6 = vld [vmem:[#allocation2 + $0x48] sm:$0xff]   ;;  %v1375_v7 = vld [vmem:[#allocation2 + $0x20] sm:$0xff]   ;;  %v1381_v8 = vld [vmem:[#allocation2 + $0x50] sm:$0xff]   ;;  %v1737_v35 = vshrl.u32 %v94_v34, 7 }
  0x4d   :  { %1315 = vmatpush3.bf16.msra.mxu0 %v1371_v1  ;;  %1335 = vmatpush3.bf16.msra.mxu1 %v1379_v4  ;;  %v1376_v9 = vld [vmem:[#allocation2 + $0x28] sm:$0xff]   ;;  %v1382_v10 = vld [vmem:[#allocation2 + $0x58] sm:$0xff]   ;;  %v1377_v11 = vld [vmem:[#allocation2 + $0x30] sm:$0xff]  }
  0x4e   :  { %1316 = vmatprep.subr.bf16.mxu0 %v1651_v0  ;;  %1336 = vmatprep.subr.bf16.mxu1 %v1651_v0  ;;  %v1383_v12 = vld [vmem:[#allocation2 + $0x60] sm:$0xff]   ;;  %v1378_v13 = vld [vmem:[#allocation2 + $0x38] sm:$0xff]   ;;  %v1384_v15 = vld [vmem:[#allocation2 + $0x68] sm:$0xff]   ;;  %v96_v36 = vsub.s32 0, %v1737_v35 }
  0x4f   :  { %v76_v14 = vld [vmem:[%s1769_s0] sm:$0xff]  ;;  %v1385_v17 = vld [vmem:[#allocation2 + $0x70] sm:$0xff]   ;;  %v1386_v18 = vld [vmem:[#allocation2 + $0x78] sm:$0xff]  }
  0x50   :  { %v93_v16 = vpack.c.bf16 %v76_v14, %v76_v14  ;;  %v1387_v19 = vld [vmem:[#allocation4] ss:$16 sps:$4 sm:$0xff]   ;;  %v1389_v20 = vld [vmem:[#allocation4 + $0x4] ss:$16 sps:$4 sm:$0xff]   ;;  %v1392_v21 = vld [vmem:[#allocation4 + $0xc] ss:$16 sps:$4 sm:$0xff]  }
  0x51   :  { %1317 = vmatpush3.bf16.msra.mxu0 %v1372_v2  ;;  %1337 = vmatpush3.bf16.msra.mxu1 %v1380_v6  ;;  %v1395_v22 = vld [vmem:[#allocation4 + $0x24] ss:$16 sps:$4 sm:$0xff]   ;;  %v1393_v23 = vld [vmem:[#allocation4 + $0x20] ss:$16 sps:$4 sm:$0xff]   ;;  %v1390_v45 = vld [vmem:[#allocation4 + $0x8] ss:$16 sps:$4 sm:$0xff]  }
  0x52   :  { %1318 = vmatprep.subr.bf16.mxu0 %v1651_v0  ;;  %1338 = vmatprep.subr.bf16.mxu1 %v1651_v0  ;;  %v1401_v24 = vld [vmem:[#allocation4 + $0x44] ss:$16 sps:$4 sm:$0xff]   ;;  %v1399_v25 = vld [vmem:[#allocation4 + $0x40] ss:$16 sps:$4 sm:$0xff]   ;;  %v1398_v47 = vld [vmem:[#allocation4 + $0x2c] ss:$16 sps:$4 sm:$0xff]  }
  0x53   :  { %v1407_v26 = vld [vmem:[#allocation4 + $0x64] ss:$16 sps:$4 sm:$0xff]   ;;  %v1405_v27 = vld [vmem:[#allocation4 + $0x60] ss:$16 sps:$4 sm:$0xff]   ;;  %v1396_v48 = vld [vmem:[#allocation4 + $0x28] ss:$16 sps:$4 sm:$0xff]  }
  0x54   :  { %v1413_v28 = vld [vmem:[#allocation4 + $0x84] ss:$16 sps:$4 sm:$0xff]   ;;  %v1411_v29 = vld [vmem:[#allocation4 + $0x80] ss:$16 sps:$4 sm:$0xff]   ;;  %v1404_v49 = vld [vmem:[#allocation4 + $0x4c] ss:$16 sps:$4 sm:$0xff]  }
  0x55   :  { %1319 = vmatpush3.bf16.msra.mxu0 %v1373_v3  ;;  %1339 = vmatpush3.bf16.msra.mxu1 %v1381_v8  ;;  %v1419_v30 = vld [vmem:[#allocation4 + $0xa4] ss:$16 sps:$4 sm:$0xff]   ;;  %v1417_v31 = vld [vmem:[#allocation4 + $0xa0] ss:$16 sps:$4 sm:$0xff]   ;;  %v1402_v50 = vld [vmem:[#allocation4 + $0x48] ss:$16 sps:$4 sm:$0xff]  }
  0x56   :  { %1320 = vmatprep.subr.bf16.mxu0 %v1651_v0  ;;  %1340 = vmatprep.subr.bf16.mxu1 %v1651_v0  ;;  %v1425_v32 = vld [vmem:[#allocation4 + $0xc4] ss:$16 sps:$4 sm:$0xff]   ;;  %v1423_v33 = vld [vmem:[#allocation4 + $0xc0] ss:$16 sps:$4 sm:$0xff]   ;;  %v1410_v51 = vld [vmem:[#allocation4 + $0x6c] ss:$16 sps:$4 sm:$0xff]  }
  0x57   :  { %v1740_v37 = vld [vmem:[#allocation7] sm:$0xff]  ;;  %v1408_v52 = vld [vmem:[#allocation4 + $0x68] ss:$16 sps:$4 sm:$0xff]   ;;  %v1416_v53 = vld [vmem:[#allocation4 + $0x8c] ss:$16 sps:$4 sm:$0xff]   ;;  %v207_v2 = vsub.s32 1, %v1737_v35 }
  0x58   :  { %v97_v38 = vrot.slane %v1740_v37, %v96_v36  ;;  %v1414_v54 = vld [vmem:[#allocation4 + $0x88] ss:$16 sps:$4 sm:$0xff]   ;;  %v1422_v55 = vld [vmem:[#allocation4 + $0xac] ss:$16 sps:$4 sm:$0xff]   ;;  %v1431_v59 = vld [vmem:[#allocation4 + $0xe4] ss:$16 sps:$4 sm:$0xff]  }
  0x59   :  { %1321 = vmatpush3.bf16.msra.mxu0 %v1374_v5  ;;  %1341 = vmatpush3.bf16.msra.mxu1 %v1382_v10  ;;  %v1420_v56 = vld [vmem:[#allocation4 + $0xa8] ss:$16 sps:$4 sm:$0xff]   ;;  %v1428_v57 = vld [vmem:[#allocation4 + $0xcc] ss:$16 sps:$4 sm:$0xff]   ;;  %v1429_v61 = vld [vmem:[#allocation4 + $0xe0] ss:$16 sps:$4 sm:$0xff]   ;;  %v208_v3 = vrot.slane %v1740_v37, %v207_v2 }
  0x5a   :  { %1322 = vmatprep.subr.bf16.mxu0 %v1651_v0  ;;  %1342 = vmatprep.subr.bf16.mxu1 %v1651_v0  ;;  %v1426_v58 = vld [vmem:[#allocation4 + $0xc8] ss:$16 sps:$4 sm:$0xff]   ;;  %v1434_v60 = vld [vmem:[#allocation4 + $0xec] ss:$16 sps:$4 sm:$0xff]  }
  0x5b   :  { %v1432_v62 = vld [vmem:[#allocation4 + $0xe8] ss:$16 sps:$4 sm:$0xff]   ;;  %v1440_v1 = vld [vmem:[#allocation6 + $0x104] ss:$8 sps:$4 sm:$0xff]   ;;  %v1446_v14 = vld [vmem:[#allocation6 + $0x114] ss:$8 sps:$4 sm:$0xff]  }
  0x5c   :  { %v1435_v10 = vld [vmem:[#allocation6] ss:$8 sps:$4 sm:$0xff]   ;;  %v1476_v34 = vld [vmem:[#allocation6 + $0x164] ss:$8 sps:$4 sm:$0xff]   ;;  %v1516_v2 = vld [vmem:[#allocation6 + $0x1d0] ss:$8 sps:$4 sm:$0xff]  }
  0x5d   :  { %1323 = vmatpush3.bf16.msra.mxu0 %v1375_v7  ;;  %1343 = vmatpush3.bf16.msra.mxu1 %v1383_v12  ;;  %v1471_v36 = vld [vmem:[#allocation6 + $0x60] ss:$8 sps:$4 sm:$0xff]  }
  0x5e   :  { %1324 = vmatprep.subr.bf16.mxu0 %v1651_v0  ;;  %1344 = vmatprep.subr.bf16.mxu1 %v1651_v0 }
  0x61   :  { %1325 = vmatpush3.bf16.msra.mxu0 %v1376_v9  ;;  %1345 = vmatpush3.bf16.msra.mxu1 %v1384_v15  ;;  %v1441_v15 = vld [vmem:[#allocation6 + $0x10] ss:$8 sps:$4 sm:$0xff]  }
  0x62   :  { %1326 = vmatprep.subr.bf16.mxu0 %v1651_v0  ;;  %1346 = vmatprep.subr.bf16.mxu1 %v1651_v0 }
  0x65   :  { %1327 = vmatpush3.bf16.msra.mxu0 %v1377_v11  ;;  %1347 = vmatpush3.bf16.msra.mxu1 %v1385_v17  ;;  %v1438_v11 = vld [vmem:[#allocation6 + $0x100] ss:$8 sps:$4 sm:$0xff]   ;;  %v1449_v17 = vld [vmem:[#allocation6 + $0x24] ss:$8 sps:$4 sm:$0xff]  }
  0x66   :  { %1328 = vmatprep.subr.bf16.mxu0 %v1651_v0  ;;  %1348 = vmatprep.subr.bf16.mxu1 %v1651_v0  ;;  %v1437_v0 = vld [vmem:[#allocation6 + $0x4] ss:$8 sps:$4 sm:$0xff]  }
  0x69   :  { %1329 = vmatpush3.bf16.msra.mxu0 %v1378_v13  ;;  %1349 = vmatpush3.bf16.msra.mxu1 %v1386_v18  ;;  %v1443_v13 = vld [vmem:[#allocation6 + $0x14] ss:$8 sps:$4 sm:$0xff]   ;;  %v1452_v18 = vld [vmem:[#allocation6 + $0x124] ss:$8 sps:$4 sm:$0xff]  }
  0x6a   :  { %529 = vmatprep.subr.bf16.mxu0 %v1389_v20  ;;  %570 = vmatprep.subr.bf16.mxu1 %v1392_v21  ;;  %v1450_v20 = vld [vmem:[#allocation6 + $0x120] ss:$8 sps:$4 sm:$0xff]   ;;  %v1455_v21 = vld [vmem:[#allocation6 + $0x34] ss:$8 sps:$4 sm:$0xff]  }
  0x6c   :  { %1331 = vmatmul.mubr.bf16.vlgmr.msra.gmra.mrb[0].mxu0 %v93_v16  ;;  %v1444_v16 = vld [vmem:[#allocation6 + $0x110] ss:$8 sps:$4 sm:$0xff]  }
  0x6d   :  { %530 = vmatpush1.bf16.msra.mxu0 %v1387_v19  ;;  %561 = vmatprep.mubr.bf16.mxu0 %v1653_v63  ;;  %v1447_v19 = vld [vmem:[#allocation6 + $0x20] ss:$8 sps:$4 sm:$0xff]  }
  0x6e   :  { %531 = vmatprep.subr.bf16.mxu0 %v1395_v22  ;;  %v1458_v22 = vld [vmem:[#allocation6 + $0x134] ss:$8 sps:$4 sm:$0xff]  }
  0x71   :  { %532 = vmatpush1.bf16.msra.mxu0 %v1393_v23  ;;  %v1453_v23 = vld [vmem:[#allocation6 + $0x30] ss:$8 sps:$4 sm:$0xff]  }
  0x72   :  { %533 = vmatprep.subr.bf16.mxu0 %v1401_v24  ;;  %v1456_v24 = vld [vmem:[#allocation6 + $0x130] ss:$8 sps:$4 sm:$0xff]  }
  0x75   :  { %534 = vmatpush1.bf16.msra.mxu0 %v1399_v25  ;;  %v1461_v25 = vld [vmem:[#allocation6 + $0x44] ss:$8 sps:$4 sm:$0xff]  }
  0x76   :  { %535 = vmatprep.subr.bf16.mxu0 %v1407_v26  ;;  %v1464_v26 = vld [vmem:[#allocation6 + $0x144] ss:$8 sps:$4 sm:$0xff]  }
  0x79   :  { %536 = vmatpush1.bf16.msra.mxu0 %v1405_v27  ;;  %v1459_v27 = vld [vmem:[#allocation6 + $0x40] ss:$8 sps:$4 sm:$0xff]  }
  0x7a   :  { %537 = vmatprep.subr.bf16.mxu0 %v1413_v28  ;;  %v1462_v28 = vld [vmem:[#allocation6 + $0x140] ss:$8 sps:$4 sm:$0xff]  }
  0x7d   :  { %538 = vmatpush1.bf16.msra.mxu0 %v1411_v29  ;;  %v1467_v29 = vld [vmem:[#allocation6 + $0x54] ss:$8 sps:$4 sm:$0xff]  }
  0x7e   :  { %539 = vmatprep.subr.bf16.mxu0 %v1419_v30  ;;  %v1470_v30 = vld [vmem:[#allocation6 + $0x154] ss:$8 sps:$4 sm:$0xff]  }
  0x81   :  { %540 = vmatpush1.bf16.msra.mxu0 %v1417_v31  ;;  %v1465_v31 = vld [vmem:[#allocation6 + $0x50] ss:$8 sps:$4 sm:$0xff]  }
  0x82   :  { %541 = vmatprep.subr.bf16.mxu0 %v1425_v32  ;;  %v1468_v32 = vld [vmem:[#allocation6 + $0x150] ss:$8 sps:$4 sm:$0xff]  }
  0x85   :  { %542 = vmatpush1.bf16.msra.mxu0 %v1423_v33  ;;  %v1473_v33 = vld [vmem:[#allocation6 + $0x64] ss:$8 sps:$4 sm:$0xff]  }
  0x86   :  { %543 = vmatprep.subr.bf16.mxu0 %v1431_v59  ;;  %v1509_v59 = vld [vmem:[#allocation6 + $0xc4] ss:$8 sps:$4 sm:$0xff]  }
  0x89   :  { %544 = vmatpush1.bf16.msra.mxu0 %v1429_v61  ;;  %v1507_v61 = vld [vmem:[#allocation6 + $0xc0] ss:$8 sps:$4 sm:$0xff]  }
  0x8a   :  { %1062 = vmatprep.subr.bf16.mxu0 %v1440_v1  ;;  %v1513_v1 = vld [vmem:[#allocation6 + $0xd0] ss:$8 sps:$4 sm:$0xff]  }
 0x13f   :  { %v180_v39 = vpop.f32.mrb[0].mxu0 }
 0x140   :  { %v181_v40 = vadd.f32 %v180_v39, %v97_v38  ;;  %v1332_v41 = vpop.f32.mrb[1].mxu0  ;;  %v1474_v38 = vld [vmem:[#allocation6 + $0x160] ss:$8 sps:$4 sm:$0xff]   ;;  %v1479_v39 = vld [vmem:[#allocation6 + $0x74] ss:$8 sps:$4 sm:$0xff]  }
 0x141   :  { %v183_v42 = vpop.f32.mrb[2].mxu0  ;;  %v1477_v41 = vld [vmem:[#allocation6 + $0x70] ss:$8 sps:$4 sm:$0xff]  }
 0x142   :  { %v186_v43 = vmax.f32 %v181_v40, 0.0  ;;  %v1333_v44 = vpop.f32.mrb[3].mxu0  ;;  %v1482_v40 = vld [vmem:[#allocation6 + $0x174] ss:$8 sps:$4 sm:$0xff]   ;;  %v1480_v42 = vld [vmem:[#allocation6 + $0x170] ss:$8 sps:$4 sm:$0xff]  }
 0x143   :  { %v1488_v44 = vld [vmem:[#allocation6 + $0x184] ss:$8 sps:$4 sm:$0xff]  }
 0x144   :  { %v204_v46 = vpack.c.bf16 %v186_v43, %v186_v43  ;;  %v1485_v43 = vld [vmem:[#allocation6 + $0x84] ss:$8 sps:$4 sm:$0xff]  }
 0x146   :  { %1351 = vmatmul.mubr.bf16.vlgmr.msra.gmra.mrb[0].mxu1 %v204_v46  ;;  %v1486_v46 = vld [vmem:[#allocation6 + $0x180] ss:$8 sps:$4 sm:$0xff]  }
 0x147   :  { %571 = vmatpush1.bf16.msra.mxu1 %v1390_v45  ;;  %602 = vmatprep.mubr.bf16.mxu1 %v1653_v63  ;;  %v1483_v45 = vld [vmem:[#allocation6 + $0x80] ss:$8 sps:$4 sm:$0xff]   ;;  %v1515_v63 = vld [vmem:[#allocation6 + $0xd4] ss:$8 sps:$4 sm:$0xff]  }
 0x148   :  { %572 = vmatprep.subr.bf16.mxu1 %v1398_v47  ;;  %v1491_v47 = vld [vmem:[#allocation6 + $0x94] ss:$8 sps:$4 sm:$0xff]  }
 0x14b   :  { %573 = vmatpush1.bf16.msra.mxu1 %v1396_v48  ;;  %v1494_v48 = vld [vmem:[#allocation6 + $0x194] ss:$8 sps:$4 sm:$0xff]  }
 0x14c   :  { %574 = vmatprep.subr.bf16.mxu1 %v1404_v49  ;;  %v1489_v49 = vld [vmem:[#allocation6 + $0x90] ss:$8 sps:$4 sm:$0xff]  }
 0x14f   :  { %575 = vmatpush1.bf16.msra.mxu1 %v1402_v50  ;;  %v1492_v50 = vld [vmem:[#allocation6 + $0x190] ss:$8 sps:$4 sm:$0xff]  }
 0x150   :  { %576 = vmatprep.subr.bf16.mxu1 %v1410_v51  ;;  %v1497_v51 = vld [vmem:[#allocation6 + $0xa4] ss:$8 sps:$4 sm:$0xff]  }
 0x153   :  { %577 = vmatpush1.bf16.msra.mxu1 %v1408_v52  ;;  %v1500_v52 = vld [vmem:[#allocation6 + $0x1a4] ss:$8 sps:$4 sm:$0xff]  }
 0x154   :  { %578 = vmatprep.subr.bf16.mxu1 %v1416_v53  ;;  %v1495_v53 = vld [vmem:[#allocation6 + $0xa0] ss:$8 sps:$4 sm:$0xff]  }
 0x157   :  { %579 = vmatpush1.bf16.msra.mxu1 %v1414_v54  ;;  %v1498_v54 = vld [vmem:[#allocation6 + $0x1a0] ss:$8 sps:$4 sm:$0xff]  }
 0x158   :  { %580 = vmatprep.subr.bf16.mxu1 %v1422_v55  ;;  %v1503_v55 = vld [vmem:[#allocation6 + $0xb4] ss:$8 sps:$4 sm:$0xff]  }
 0x15b   :  { %581 = vmatpush1.bf16.msra.mxu1 %v1420_v56  ;;  %v1506_v56 = vld [vmem:[#allocation6 + $0x1b4] ss:$8 sps:$4 sm:$0xff]  }
 0x15c   :  { %582 = vmatprep.subr.bf16.mxu1 %v1428_v57  ;;  %v1501_v57 = vld [vmem:[#allocation6 + $0xb0] ss:$8 sps:$4 sm:$0xff]  }
 0x15f   :  { %583 = vmatpush1.bf16.msra.mxu1 %v1426_v58  ;;  %v1504_v58 = vld [vmem:[#allocation6 + $0x1b0] ss:$8 sps:$4 sm:$0xff]  }
 0x160   :  { %584 = vmatprep.subr.bf16.mxu1 %v1434_v60  ;;  %v1512_v60 = vld [vmem:[#allocation6 + $0x1c4] ss:$8 sps:$4 sm:$0xff]  }
 0x163   :  { %585 = vmatpush1.bf16.msra.mxu1 %v1432_v62  ;;  %v1510_v62 = vld [vmem:[#allocation6 + $0x1c0] ss:$8 sps:$4 sm:$0xff]  }
 0x164   :  { %1021 = vmatprep.subr.bf16.mxu1 %v1437_v0  ;;  %v1518_v0 = vld [vmem:[#allocation6 + $0x1d4] ss:$8 sps:$4 sm:$0xff]  }
 0x219   :  { %v291_v4 = vpop.f32.mrb[0].mxu1 }
 0x21a   :  { %v292_v5 = vadd.f32 %v291_v4, %v208_v3  ;;  %v1352_v6 = vpop.f32.mrb[1].mxu1  ;;  %v1521_v3 = vld [vmem:[#allocation6 + $0xe4] ss:$8 sps:$4 sm:$0xff]  }
 0x21b   :  { %v294_v7 = vpop.f32.mrb[2].mxu1  ;;  %v1524_v4 = vld [vmem:[#allocation6 + $0x1e4] ss:$8 sps:$4 sm:$0xff]   ;;  %v1522_v6 = vld [vmem:[#allocation6 + $0x1e0] ss:$8 sps:$4 sm:$0xff]  }
 0x21c   :  { %v297_v8 = vmax.f32 %v292_v5, 0.0  ;;  %v1353_v9 = vpop.f32.mrb[3].mxu1  ;;  %v1519_v5 = vld [vmem:[#allocation6 + $0xe0] ss:$8 sps:$4 sm:$0xff]   ;;  %v1527_v7 = vld [vmem:[#allocation6 + $0xf4] ss:$8 sps:$4 sm:$0xff]  }
 0x21d   :  { %v1525_v9 = vld [vmem:[#allocation6 + $0xf0] ss:$8 sps:$4 sm:$0xff]  }
 0x21e   :  { %v330_v12 = vpack.c.bf16 %v297_v8, %v297_v8  ;;  %v1530_v8 = vld [vmem:[#allocation6 + $0x1f4] ss:$8 sps:$4 sm:$0xff]  }
 0x220   :  { %562 = vmatmul.mubr.bf16.vlgmr.msra.gmra.mrb[4].mxu0 %v330_v12  ;;  %603 = vmatmul.mubr.bf16.vlgmr.msra.gmra.mrb[4].mxu1 %v330_v12  ;;  %v75_v12 = vld [vmem:[#allocation7 + $0x8] sm:$0xff] }
 0x221   :  { %1022 = vmatpush1.bf16.msra.mxu1 %v1435_v10  ;;  %1063 = vmatpush1.bf16.msra.mxu0 %v1438_v11  ;;  %v1528_v10 = vld [vmem:[#allocation6 + $0x1f0] ss:$8 sps:$4 sm:$0xff]   ;;  %v335_v11 = vsub.s32 2, %v1737_v35 }
 0x222   :  { %1023 = vmatprep.subr.bf16.mxu1 %v1443_v13  ;;  %1064 = vmatprep.subr.bf16.mxu0 %v1446_v14  ;;  %v339_v13 = vsub.s32 6, %v1737_v35 }
 0x223   :  { %v336_v14 = vrot.slane %v1740_v37, %v335_v11 }
 0x225   :  { %1024 = vmatpush1.bf16.msra.mxu1 %v1441_v15  ;;  %1065 = vmatpush1.bf16.msra.mxu0 %v1444_v16  ;;  %v344_v15 = vrot.slane %v75_v12, %v335_v11  ;;  %v340_v16 = vrot.slane %v1740_v37, %v339_v13 }
 0x226   :  { %1025 = vmatprep.subr.bf16.mxu1 %v1449_v17  ;;  %1066 = vmatprep.subr.bf16.mxu0 %v1452_v18  ;;  %v348_v17 = vrot.slane %v75_v12, %v339_v13  ;;  %v356_v18 = vrot.slane %v336_v14, %v335_v11 }
 0x229   :  { %1026 = vmatpush1.bf16.msra.mxu1 %v1447_v19  ;;  %1067 = vmatpush1.bf16.msra.mxu0 %v1450_v20  ;;  %v364_v19 = vrot.slane %v344_v15, %v335_v11  ;;  %v360_v20 = vrot.slane %v340_v16, %v335_v11 }
 0x22a   :  { %1027 = vmatprep.subr.bf16.mxu1 %v1455_v21  ;;  %1068 = vmatprep.subr.bf16.mxu0 %v1458_v22  ;;  %v368_v21 = vrot.slane %v348_v17, %v335_v11 }
 0x22d   :  { %1028 = vmatpush1.bf16.msra.mxu1 %v1453_v23  ;;  %1069 = vmatpush1.bf16.msra.mxu0 %v1456_v24 }
 0x22e   :  { %1029 = vmatprep.subr.bf16.mxu1 %v1461_v25  ;;  %1070 = vmatprep.subr.bf16.mxu0 %v1464_v26 }
 0x231   :  { %1030 = vmatpush1.bf16.msra.mxu1 %v1459_v27  ;;  %1071 = vmatpush1.bf16.msra.mxu0 %v1462_v28 }
 0x232   :  { %1031 = vmatprep.subr.bf16.mxu1 %v1467_v29  ;;  %1072 = vmatprep.subr.bf16.mxu0 %v1470_v30 }
 0x235   :  { %1032 = vmatpush1.bf16.msra.mxu1 %v1465_v31  ;;  %1073 = vmatpush1.bf16.msra.mxu0 %v1468_v32 }
 0x236   :  { %1033 = vmatprep.subr.bf16.mxu1 %v1473_v33  ;;  %1074 = vmatprep.subr.bf16.mxu0 %v1476_v34 }
 0x239   :  { %1034 = vmatpush1.bf16.msra.mxu1 %v1471_v36  ;;  %1075 = vmatpush1.bf16.msra.mxu0 %v1474_v38 }
 0x23a   :  { %1035 = vmatprep.subr.bf16.mxu1 %v1479_v39  ;;  %1076 = vmatprep.subr.bf16.mxu0 %v1482_v40 }
 0x23d   :  { %1036 = vmatpush1.bf16.msra.mxu1 %v1477_v41  ;;  %1077 = vmatpush1.bf16.msra.mxu0 %v1480_v42 }
 0x23e   :  { %1037 = vmatprep.subr.bf16.mxu1 %v1485_v43  ;;  %1078 = vmatprep.subr.bf16.mxu0 %v1488_v44  ;;  %v685_v44 = vsub.s32 3, %v1737_v35 }
 0x241   :  { %1038 = vmatpush1.bf16.msra.mxu1 %v1483_v45  ;;  %1079 = vmatpush1.bf16.msra.mxu0 %v1486_v46  ;;  %v689_v45 = vsub.s32 7, %v1737_v35  ;;  %v686_v46 = vrot.slane %v1740_v37, %v685_v44 }
 0x242   :  { %1039 = vmatprep.subr.bf16.mxu1 %v1491_v47  ;;  %1080 = vmatprep.subr.bf16.mxu0 %v1494_v48 }
 0x243   :  { %v690_v47 = vrot.slane %v1740_v37, %v689_v45  ;;  %v696_v48 = vrot.slane %v686_v46, %v685_v44 }
 0x245   :  { %1040 = vmatpush1.bf16.msra.mxu1 %v1489_v49  ;;  %1081 = vmatpush1.bf16.msra.mxu0 %v1492_v50  ;;  %v700_v49 = vrot.slane %v690_v47, %v685_v44 }
 0x246   :  { %1041 = vmatprep.subr.bf16.mxu1 %v1497_v51  ;;  %1082 = vmatprep.subr.bf16.mxu0 %v1500_v52 }
 0x249   :  { %1042 = vmatpush1.bf16.msra.mxu1 %v1495_v53  ;;  %1083 = vmatpush1.bf16.msra.mxu0 %v1498_v54 }
 0x24a   :  { %1043 = vmatprep.subr.bf16.mxu1 %v1503_v55  ;;  %1084 = vmatprep.subr.bf16.mxu0 %v1506_v56 }
 0x24d   :  { %1044 = vmatpush1.bf16.msra.mxu1 %v1501_v57  ;;  %1085 = vmatpush1.bf16.msra.mxu0 %v1504_v58 }
 0x24e   :  { %1045 = vmatprep.subr.bf16.mxu1 %v1509_v59  ;;  %1086 = vmatprep.subr.bf16.mxu0 %v1512_v60 }
 0x251   :  { %1046 = vmatpush1.bf16.msra.mxu1 %v1507_v61  ;;  %1087 = vmatpush1.bf16.msra.mxu0 %v1510_v62 }
 0x252   :  { %1047 = vmatprep.subr.bf16.mxu1 %v1515_v63  ;;  %1088 = vmatprep.subr.bf16.mxu0 %v1518_v0 }
 0x255   :  { %1048 = vmatpush1.bf16.msra.mxu1 %v1513_v1  ;;  %1089 = vmatpush1.bf16.msra.mxu0 %v1516_v2 }
 0x256   :  { %1049 = vmatprep.subr.bf16.mxu1 %v1521_v3  ;;  %1090 = vmatprep.subr.bf16.mxu0 %v1524_v4 }
 0x259   :  { %1050 = vmatpush1.bf16.msra.mxu1 %v1519_v5  ;;  %1091 = vmatpush1.bf16.msra.mxu0 %v1522_v6 }
 0x25a   :  { %1051 = vmatprep.subr.bf16.mxu1 %v1527_v7  ;;  %1092 = vmatprep.subr.bf16.mxu0 %v1530_v8 }
 0x25d   :  { %1052 = vmatpush1.bf16.msra.mxu1 %v1525_v9  ;;  %1093 = vmatpush1.bf16.msra.mxu0 %v1528_v10 }
 0x2f3   :  { %v563_v22 = vpop.f32.mrb[4].mxu0  ;;  %v604_v23 = vpop.f32.mrb[4].mxu1 }
 0x2f4   :  { %v564_v24 = vadd.f32 %v563_v22, %v356_v18  ;;  %v605_v25 = vadd.f32 %v604_v23, %v364_v19  ;;  %v565_v26 = vpop.f32.mrb[5].mxu0  ;;  %v606_v27 = vpop.f32.mrb[5].mxu1 }
 0x2f5   :  { %v566_v28 = vadd.f32 %v565_v26, %v360_v20  ;;  %v607_v29 = vadd.f32 %v606_v27, %v368_v21  ;;  %v567_v30 = vpop.f32.mrb[6].mxu0  ;;  %v608_v31 = vpop.f32.mrb[6].mxu1 }
 0x2f6   :  { %v611_v32 = vmax.f32 %v564_v24, 0.0  ;;  %v613_v33 = vmax.f32 %v605_v25, 0.0  ;;  %v568_v34 = vpop.f32.mrb[7].mxu0  ;;  %v609_v36 = vpop.f32.mrb[7].mxu1 }
 0x2f7   :  { %v612_v38 = vmax.f32 %v566_v28, 0.0  ;;  %v614_v39 = vmax.f32 %v607_v29, 0.0 }
 0x2f8   :  { %v679_v42 = vpack.c.bf16 %v611_v32, %v611_v32  ;;  %v681_v43 = vpack.c.bf16 %v613_v33, %v613_v33 }
 0x2f9   :  { %v680_v40 = vpack.c.bf16 %v612_v38, %v612_v38  ;;  %v682_v41 = vpack.c.bf16 %v614_v39, %v614_v39 }
 0x2fb   :  { %1053 = vmatprep.mubr.bf16.mxu1 %v680_v40  ;;  %1094 = vmatprep.mubr.bf16.mxu0 %v682_v41 }
 0x2fc   :  { %1054 = vmatmul.mubr.bf16.vlgmr.msra.gmra.mrb[8].mxu1 %v679_v42  ;;  %1095 = vmatmul.mubr.bf16.vlgmr.msra.gmra.mrb[8].mxu0 %v681_v43 }
 0x3cf   :  { %v1055_v50 = vpop.f32.mrb[8].mxu1  ;;  %v1096_v51 = vpop.f32.mrb[8].mxu0 }
 0x3d0   :  { %v1056_v52 = vadd.f32 %v1055_v50, %v696_v48  ;;  %v1057_v53 = vpop.f32.mrb[9].mxu1  ;;  %v1098_v54 = vpop.f32.mrb[9].mxu0 }
 0x3d1   :  { %v1058_v55 = vadd.f32 %v1057_v53, %v700_v49  ;;  %v1059_v56 = vpop.f32.mrb[10].mxu1  ;;  %v1100_v57 = vpop.f32.mrb[10].mxu0 }
 0x3d2   :  { %v1097_v58 = vadd.f32 %v1096_v51, %v1056_v52  ;;  %v1060_v59 = vpop.f32.mrb[11].mxu1  ;;  %v1101_v60 = vpop.f32.mrb[11].mxu0 }
 0x3d3   :  { %v1099_v35 = vadd.f32 %v1098_v54, %v1058_v55 }
 0x3d4   :  { %v1120_v61 = vsel %vm1119_vm1, %v1097_v58, -inf  ;;  %v1104_v62 = vsel %vm1103_vm2, %v1097_v58, -inf }
 0x3d5   :  { %1121 = vmax.xlane.f32.xlu0 %v1120_v61  ;;  %1105 = vmax.xlane.f32.xlu1 %v1104_v62  ;;  %v1154_v37 = vsel %vm1119_vm1, %v1099_v35, -inf  ;;  %v1139_v63 = vsel %vm1103_vm2, %v1099_v35, -inf }
 0x3d9   :  { %1155 = vmax.xlane.f32.xlu0 %v1154_v37  ;;  %1140 = vmax.xlane.f32.xlu1 %v1139_v63 }
 0x462   :  { %v1122_v0 = vpop.xlane.xlu0 %1121  ;;  %v1106_v10 = vpop.xlane.xlu1 %1105 }
 0x463   :  { %v1123_v1 = vsub.f32 %v1097_v58, %v1122_v0  ;;  %v1107_v11 = vsub.f32 %v1097_v58, %v1106_v10 }
 0x465   :  { %v1124_v2 = vmax.f32 %v1123_v1, -60.0  ;;  %v1108_v12 = vmax.f32 %v1107_v11, -60.0 }
 0x466   :  { %v1156_v3 = vpop.xlane.xlu0 %1155  ;;  %v1141_v16 = vpop.xlane.xlu1 %1140 }
 0x467   :  { %v1125_v4 = vmul.f32 1.442695, %v1124_v2  ;;  %v1157_v5 = vsub.f32 %v1099_v35, %v1156_v3  ;;  %v1109_v13 = vmul.f32 1.442695, %v1108_v12  ;;  %v1142_v17 = vsub.f32 %v1099_v35, %v1141_v16 }
 0x469   :  { %1531 = vpow2.f32 %v1125_v4  ;;  %v1158_v6 = vmax.f32 %v1157_v5, -60.0  ;;  %v1143_v18 = vmax.f32 %v1142_v17, -60.0 }
 0x46b   :  { %v1159_v7 = vmul.f32 1.442695, %v1158_v6  ;;  %v1144_v19 = vmul.f32 1.442695, %v1143_v18 }
 0x46d   :  { %1533 = vpow2.f32 %v1159_v7 }
 0x46e   :  { %1535 = vpow2.f32 %v1109_v13 }
 0x46f   :  { %1537 = vpow2.f32 %v1144_v19 }
 0x473   :  { %v1532_v8 = vpop.eup %1531 }
 0x474   :  { %1128 = vrot.lane.b32.xlu0 %v1532_v8, %s1645_s2 }
 0x477   :  { %v1534_v9 = vpop.eup %1533 }
 0x478   :  { %1162 = vrot.lane.b32.xlu1 %v1534_v9, %s1645_s2  ;;  %v1536_v14 = vpop.eup %1535 }
 0x479   :  { %v1111_v15 = vsel %vm1103_vm2, %v1536_v14, 0.0  ;;  %v1538_v22 = vpop.eup %1537 }
 0x47a   :  { %v1146_v24 = vsel %vm1103_vm2, %v1538_v22, 0.0 }
 0x49c   :  { %1112 = vadd.xlane.f32.xlu1 %v1111_v15 }
 0x4e6   :  { %v1129_v20 = vpop.permute.xlu0 %1128 }
 0x4e7   :  { %v1131_v21 = vsel %vm1103_vm2, %v1129_v20, 0.0 }
 0x4e8   :  { %1132 = vadd.xlane.f32.xlu0 %v1131_v21 }
 0x4ea   :  { %v1163_v23 = vpop.permute.xlu1 %1162 }
 0x4eb   :  { %v1165_v25 = vsel %vm1103_vm2, %v1163_v23, 0.0 }
 0x4ec   :  { %1147 = vadd.xlane.f32.xlu0 %v1146_v24  ;;  %1166 = vadd.xlane.f32.xlu1 %v1165_v25 }
 0x529   :  { %v1113_v26 = vpop.xlane.xlu1 %1112 }
 0x52a   :  { %1539 = vrcp.f32 %v1113_v26 }
 0x534   :  { %v1540_v28 = vpop.eup %1539 }
 0x535   :  { %v1115_v31 = vmul.f32 %v1540_v28, %v1113_v26 }
 0x537   :  { %v1116_v32 = vsub.f32 2.0, %v1115_v31 }
 0x539   :  { %v1117_v36 = vmul.f32 %v1540_v28, %v1116_v32 }
 0x53b   :  { %v1118_v44 = vmul.f32 %v1536_v14, %v1117_v36 }
 0x575   :  { %v1133_v27 = vpop.xlane.xlu0 %1132 }
 0x576   :  { %1541 = vrcp.f32 %v1133_v27 }
 0x579   :  { %v1148_v29 = vpop.xlane.xlu0 %1147  ;;  %v1167_v30 = vpop.xlane.xlu1 %1166 }
 0x57a   :  { %1543 = vrcp.f32 %v1148_v29 }
 0x57b   :  { %1545 = vrcp.f32 %v1167_v30 }
 0x580   :  { %v1542_v33 = vpop.eup %1541 }
 0x581   :  { %v1135_v34 = vmul.f32 %v1542_v33, %v1133_v27 }
 0x583   :  { %v1136_v38 = vsub.f32 2.0, %v1135_v34 }
 0x584   :  { %v1544_v39 = vpop.eup %1543 }
 0x585   :  { %v1546_v40 = vpop.eup %1545  ;;  %v1137_v41 = vmul.f32 %v1542_v33, %v1136_v38  ;;  %v1150_v42 = vmul.f32 %v1544_v39, %v1148_v29 }
 0x586   :  { %v1169_v43 = vmul.f32 %v1546_v40, %v1167_v30 }
 0x587   :  { %v1138_v45 = vmul.f32 %v1532_v8, %v1137_v41  ;;  %v1151_v46 = vsub.f32 2.0, %v1150_v42 }
 0x588   :  { %v1170_v47 = vsub.f32 2.0, %v1169_v43 }
 0x589   :  { %v1173_v48 = vsel %vm1103_vm2, %v1118_v44, %v1138_v45  ;;  %v1152_v49 = vmul.f32 %v1544_v39, %v1151_v46 }
 0x58a   :  { %1175 = vst [vmem:[%s1774_s5] sm:$0xff] %v1173_v48  ;;  %v1171_v50 = vmul.f32 %v1546_v40, %v1170_v47 }
 0x58b   :  { %v1153_v51 = vmul.f32 %v1538_v22, %v1152_v49 }
 0x58c   :  { %v1172_v52 = vmul.f32 %v1534_v9, %v1171_v50 }
 0x58e   :  { %v1174_v53 = vsel %vm1103_vm2, %v1153_v51, %v1172_v52 }
 0x58f   :  { %1176 = vst [vmem:[%s1774_s5 + $0x8] sm:$0xff] %v1174_v53 }
 0x590   :  { %1181 = vsyncpa [#allocation3], 1 }
 0x591   :  { %1182 = vsyncpa [#allocation5], 1 }
 0x592   :  { %1183 = vsyncpa [#allocation8], 1 }

</bundles_post_ra>
